<compile_context>
chip_gen: v7x
topology: tpu7x:2x2x1
jax: 0.10.0
libtpu: 0.0.40
codegen_flags: <defaults>
</compile_context>

<pallas_src>
import functools

import jax
import jax.numpy as jnp
from jax.experimental import pallas as pl
from jax.experimental.pallas import tpu as pltpu


_TARGET_STEP_BYTES = 8 << 20   # aim for ~8 MiB of streamed x per grid step
_MIN_ROWS = 8                  # sublane granularity


# ---------------------------------------------------------------------------
# kernels
# ---------------------------------------------------------------------------

def _make_packed_kernel(precision):
    """Lane-dense path.
    x_ref  : (TR, 128)  packed batch tile (G = 128//D original rows per packed row)
    w_ref  : (128, G)   block-diagonal folded weights (VMEM-resident, x's dtype)
    b_ref  : (1,)       folded bias (SMEM scalar)
    out_ref: (TR, G)    f32; flat order == original row order
    """
    def kernel(x_ref, w_ref, b_ref, out_ref):
        y = jnp.dot(x_ref[...], w_ref[...],
                    preferred_element_type=jnp.float32, precision=precision)
        out_ref[...] = y + b_ref[0]
    return kernel


def _make_general_kernel(d_total, d_tile, mask_tail):
    """General path: (TB, TD) tile -> f32 multiply + lane reduce, accumulated into
    the resident (TB, 1) output block across the trailing ("arbitrary") D axis."""
    def kernel(x_ref, w_ref, b_ref, out_ref):
        d = pl.program_id(1)
        x = x_ref[...].astype(jnp.float32)
        w = w_ref[...].astype(jnp.float32)
        if mask_tail:
            # The last D block overhangs the array: zero both x and w in the
            # overhang so stale VMEM contents (possibly NaN) can't contaminate
            # the reduction.
            xc = jax.lax.broadcasted_iota(jnp.int32, x.shape, 1) + d * d_tile
            wc = jax.lax.broadcasted_iota(jnp.int32, w.shape, 1) + d * d_tile
            x = jnp.where(xc < d_total, x, 0.0)
            w = jnp.where(wc < d_total, w, 0.0)
        part = jnp.sum(x * w, axis=-1, keepdims=True)   # (TB, 1) f32

        @pl.when(d == 0)
        def _init():
            out_ref[...] = jnp.zeros_like(out_ref)

        out_ref[...] += part

        @pl.when(d == pl.num_programs(1) - 1)
        def _finalize():
            out_ref[...] += b_ref[0]

    return kernel


# ---------------------------------------------------------------------------
# sizing helpers
# ---------------------------------------------------------------------------

def _round_up(n, m):
    return ((n + m - 1) // m) * m


def _vmem_capacity_bytes():
    try:
        return int(pltpu.get_tpu_info().vmem_capacity_bytes)
    except Exception:
        return 64 << 20   # conservative fallback: v7x has the smallest per-TC VMEM


def _vmem_limit_bytes(footprint, capacity):
    # Enough scoped VMEM for the chosen tiles (with headroom) but well under the
    # physical capacity of whatever generation we compile for; never below the
    # 32 MiB default so we don't accidentally shrink the compiler's budget.
    want = 2 * footprint + (4 << 20)
    return int(min((capacity * 3) // 4, max(32 << 20, want)))


def _pick_rows(total_rows, hbm_row_bytes, vmem_row_bytes, vmem_budget):
    """Batch-tile rows: ~_TARGET_STEP_BYTES of streamed HBM bytes per grid step,
    clamped by the padded/double-buffered VMEM footprint and capped so that the
    'parallel' batch axis keeps >= 2 grid steps (both v7x TensorCores busy)."""
    rows = max(_MIN_ROWS, _TARGET_STEP_BYTES // max(hbm_row_bytes, 1))
    rows = min(rows, max(_MIN_ROWS, vmem_budget // max(vmem_row_bytes, 1)))
    if total_rows > 2 * _MIN_ROWS:
        rows = min(rows, pl.cdiv(total_rows, 2))
    rows = min(rows, max(total_rows, _MIN_ROWS))
    return _round_up(rows, _MIN_ROWS)


def _fold_params(params):
    """Collapse the activation-free 4-layer chain into one (1, D) row + scalar."""
    f32 = lambda a: jnp.asarray(a, jnp.float32)
    w1, b1 = f32(params["w1"]), f32(params["b1"])
    w2, b2 = f32(params["w2"]), f32(params["b2"])
    w3, b3 = f32(params["w3"]), f32(params["b3"])
    w4, b4 = f32(params["w4"]), f32(params["b4"])
    w_eff = (((w1 @ w2) @ w3) @ w4).T                 # (1, D)
    b_eff = ((b1 @ w2 + b2) @ w3 + b3) @ w4 + b4      # (1, 1)
    return w_eff, b_eff.reshape((1,))


# ---------------------------------------------------------------------------
# forward
# ---------------------------------------------------------------------------

@functools.partial(jax.jit, static_argnames=("d_block",))
def fc_nn_forward(x, params, d_block=None):
    """x: (batch, input_size); params: dict of (in,out) weights / (1,out) biases.
    Returns (batch,) f32, matching FC_NN.forward(...).view(-1).
    d_block: optional override (multiple of 128) forcing D-tiling (testing)."""
    B, D = x.shape
    w_eff, b_eff = _fold_params(params)      # (1, D) f32, (1,) f32 — tiny one-off matmuls

    in_bytes = x.dtype.itemsize
    capacity = _vmem_capacity_bytes()
    budget = max((capacity * 35) // 100 - (1 << 20), 4 << 20)   # tile-sizing budget

    groups = 128 // D if (0 < D <= 128 and 128 % D == 0) else 0
    use_packed = (d_block is None) and groups > 0 and B > 0 and B % groups == 0

    if use_packed:
        G = groups
        Bp = B // G
        xp = x.reshape(Bp, 128)   # free bitcast reshape: every row is lane-dense
        # (128, G) block-diagonal weights: column g holds w_eff in rows [g*D, (g+1)*D).
        wp = jnp.kron(jnp.eye(G, dtype=jnp.float32),
                      w_eff.reshape(D, 1)).astype(x.dtype)

        # per packed row: double-buffered input + lane-padded double-buffered out
        vmem_row = 2 * 128 * in_bytes + 2 * 128 * 4 + 128
        tr = _pick_rows(Bp, 128 * in_bytes, vmem_row, budget)
        footprint = tr * vmem_row + 128 * G * 4 + (1 << 20)

        precision = (jax.lax.Precision.HIGHEST if x.dtype == jnp.float32
                     else jax.lax.Precision.DEFAULT)
        out = pl.pallas_call(
            _make_packed_kernel(precision),
            out_shape=jax.ShapeDtypeStruct((Bp, G), jnp.float32),
            grid=(pl.cdiv(Bp, tr),),   # ragged last block OK: rows are independent
            in_specs=[
                pl.BlockSpec((tr, 128), lambda i: (i, 0)),            # streamed x
                pl.BlockSpec((128, G), lambda i: (0, 0)),             # resident weights
                pl.BlockSpec(memory_space=pltpu.MemorySpace.SMEM),    # scalar bias
            ],
            out_specs=pl.BlockSpec((tr, G), lambda i: (i, 0)),
            compiler_params=pltpu.CompilerParams(
                dimension_semantics=("parallel",),
                vmem_limit_bytes=_vmem_limit_bytes(footprint, capacity),
            ),
        )(xp, wp, b_eff)
        return out.reshape(-1)   # packed (r, g) -> original row r*G + g

    # ---- general path: any D / ragged B (lane-sparse for D<128 but still 1x HBM) ----
    d_pad = _round_up(D, 128)
    if d_block is not None:
        assert d_block % 128 == 0, "d_block must be a multiple of 128"
        td = min(d_block, d_pad)
    elif _MIN_ROWS * (d_pad * (2 * in_bytes + 4) + 1024) > budget:
        # Extreme D: tile the reduction axis instead of blowing VMEM.
        td = min(d_pad, max(128, budget // (_MIN_ROWS * (2 * in_bytes + 4)) // 128 * 128))
    else:
        td = D                   # single D tile: block minor dim == full D (any value)
    n_d = pl.cdiv(D, td)
    mask_tail = (td != D) and (D % td != 0)
    lanes = td if td != D else d_pad            # VMEM lane footprint of one block row

    vmem_row = lanes * (2 * in_bytes + 4) + 2 * 128 * 4 + 128
    tb = _pick_rows(B, min(td, D) * in_bytes, vmem_row, budget)
    footprint = tb * vmem_row + (1 << 20)

    out = pl.pallas_call(
        _make_general_kernel(D, td, mask_tail),
        out_shape=jax.ShapeDtypeStruct((B, 1), jnp.float32),
        grid=(pl.cdiv(B, tb), n_d),             # reduction (D) axis last
        in_specs=[
            pl.BlockSpec((tb, td), lambda i, d: (i, d)),
            pl.BlockSpec((1, td), lambda i, d: (0, d)),
            pl.BlockSpec(memory_space=pltpu.MemorySpace.SMEM),
        ],
        out_specs=pl.BlockSpec((tb, 1), lambda i, d: (i, 0)),   # resident across D
        compiler_params=pltpu.CompilerParams(
            dimension_semantics=("parallel", "arbitrary"),
            vmem_limit_bytes=_vmem_limit_bytes(footprint, capacity),
        ),
    )(x, w_eff, b_eff)
    return out[:, 0]   # == output.view(-1)


def init_params(key, input_size):
    """Deterministic init mimicking nn.Linear defaults (uniform +-1/sqrt(fan_in)).
    Weights stored as (in_features, out_features)."""
    def linear(key, fan_in, fan_out):
        kw, kb = jax.random.split(key)
        bound = 1.0 / jnp.sqrt(jnp.float32(fan_in))
        w = jax.random.uniform(kw, (fan_in, fan_out), jnp.float32, -bound, bound)
        b = jax.random.uniform(kb, (1, fan_out), jnp.float32, -bound, bound)
        return w, b

    k1, k2, k3, k4 = jax.random.split(key, 4)
    w1, b1 = linear(k1, input_size, 8)
    w2, b2 = linear(k2, 8, 16)
    w3, b3 = linear(k3, 16, input_size)
    w4, b4 = linear(k4, input_size, 1)
    return {"w1": w1, "b1": b1, "w2": w2, "b2": b2,
            "w3": w3, "b3": b3, "w4": w4, "b4": b4}


if __name__ == "__main__":
    key = jax.random.PRNGKey(0)
    k_x, k_p, k_x2, k_x3, k_p3 = jax.random.split(key, 5)

    # Pure-JAX reference of the original 4-layer chain (module semantics).
    def ref(x, p):
        h = x @ p["w1"] + p["b1"]
        h = h @ p["w2"] + p["b2"]
        h = h @ p["w3"] + p["b3"]
        return (h @ p["w4"] + p["b4"]).reshape(-1)

    # 1) packed lane-dense path (D=16 divides 128, B % 8 == 0), f32 stream.
    B, D = 256, 16
    params = init_params(k_p, D)
    x = jax.random.normal(k_x, (B, D), jnp.float32)
    y = fc_nn_forward(x, params)
    jax.block_until_ready(y)
    assert y.shape == (B,)
    assert jnp.allclose(y, ref(x, params), atol=1e-3, rtol=1e-3)

    # 2) packed path with a bf16 stream (halves HBM bytes; MXU accumulates in f32).
    y16 = fc_nn_forward(x.astype(jnp.bfloat16), params)
    jax.block_until_ready(y16)
    assert y16.shape == (B,)
    assert jnp.allclose(y16, ref(x, params), atol=3e-2, rtol=3e-2)

    # 3) general path: ragged batch (13 % 8 != 0) -> cdiv grid, no jnp.pad copy.
    x2 = jax.random.normal(k_x2, (13, D), jnp.float32)
    y2 = fc_nn_forward(x2, params)
    jax.block_until_ready(y2)
    assert y2.shape == (13,)
    assert jnp.allclose(y2, ref(x2, params), atol=1e-4, rtol=1e-4)

    # 4) general path with forced D tiling (3 blocks of 128, masked ragged tail).
    B3, D3 = 64, 300
    params3 = init_params(k_p3, D3)
    x3 = jax.random.normal(k_x3, (B3, D3), jnp.float32)
    y3 = fc_nn_forward(x3, params3, d_block=128)
    jax.block_until_ready(y3)
    assert y3.shape == (B3,)
    assert jnp.allclose(y3, ref(x3, params3), atol=1e-3, rtol=1e-3)

    print("KERNEL_OK")
</pallas_src>

<mosaic_0001>
module attributes {stable_mosaic.version = 11 : i64} {
  func.func @kernel(%arg0: i32, %arg1: memref<16x128xf32, #tpu.memory_space<vmem>>, %arg2: memref<128x8xf32, #tpu.memory_space<vmem>>, %arg3: memref<1xf32, #tpu.memory_space<smem>>, %arg4: memref<16x8xf32, #tpu.memory_space<vmem>>) attributes {dimension_semantics = [#tpu.dimension_semantics<parallel>], iteration_bounds = array<i64: 2>, scalar_prefetch = 0 : i64, scratch_operands = 0 : i64, tpu.core_type = #tpu.core_type<tc>, window_params = [{transform_indices = @transform_0, window_bounds = array<i64: 16, 128>}, {pipeline_mode = #tpu.pipeline_mode<synchronous>, transform_indices = @transform_1, window_bounds = array<i64: 128, 8>}, {transform_indices = @transform_2, window_bounds = array<i64: 1>}, {transform_indices = @transform_3, window_bounds = array<i64: 16, 8>}]} {
    %c0 = arith.constant 0 : index
    %c0_0 = arith.constant 0 : index
    %0 = vector.load %arg1[%c0, %c0_0] : memref<16x128xf32, #tpu.memory_space<vmem>>, vector<16x128xf32>
    %c0_1 = arith.constant 0 : index
    %c0_2 = arith.constant 0 : index
    %1 = vector.load %arg2[%c0_1, %c0_2] : memref<128x8xf32, #tpu.memory_space<vmem>>, vector<128x8xf32>
    %cst = arith.constant dense<0.000000e+00> : vector<16x8xf32>
    %2 = tpu.matmul %0, %1, %cst {dimension_numbers = #tpu.dot_dimension_numbers<[1], [0], [0], [1], [0, 0, 1, 1], [], []>, precision = #tpu.contract_precision<fp32>} : vector<16x128xf32>, vector<128x8xf32>, vector<16x8xf32> -> vector<16x8xf32>
    %c0_3 = arith.constant 0 : index
    %3 = memref.load %arg3[%c0_3] : memref<1xf32, #tpu.memory_space<smem>>
    %4 = vector.broadcast %3 : f32 to vector<16x8xf32>
    %5 = arith.addf %2, %4 : vector<16x8xf32>
    %c0_4 = arith.constant 0 : index
    %c0_5 = arith.constant 0 : index
    %6 = vector.load %arg4[%c0_4, %c0_5] : memref<16x8xf32, #tpu.memory_space<vmem>>, vector<16x8xf32>
    tpu.vector_store %arg4[%c0_4, %c0_5], %5 {strides = array<i32>} : memref<16x8xf32, #tpu.memory_space<vmem>>, vector<16x8xf32>,
    return
  }
  func.func @transform_0(%arg0: i32) -> (i32, i32) {
    %c0_i32 = arith.constant 0 : i32
    %c0_i32_0 = arith.constant 0 : i32
    return %arg0, %c0_i32 : i32, i32
  }
  func.func @transform_1(%arg0: i32) -> (i32, i32) {
    %c0_i32 = arith.constant 0 : i32
    %c0_i32_0 = arith.constant 0 : i32
    %c0_i32_1 = arith.constant 0 : i32
    return %c0_i32, %c0_i32_0 : i32, i32
  }
  func.func @transform_2(%arg0: i32) -> i32 {
    %c0_i32 = arith.constant 0 : i32
    %c0_i32_0 = arith.constant 0 : i32
    return %c0_i32 : i32
  }
  func.func @transform_3(%arg0: i32) -> (i32, i32) {
    %c0_i32 = arith.constant 0 : i32
    %c0_i32_0 = arith.constant 0 : i32
    return %arg0, %c0_i32 : i32, i32
  }
}

</mosaic_0001>

<bundles_post_ra>
// kernel: fc_nn_forward.1
= control target key start
LH: loop header
LB: loop body
LE: loop exit
PB: predicated region body
PF: predicated region fallthrough
CT: control target
= control target key end

     0   :  { %s1510_s14 = smov 0   ;;  %s1856_s0 = inlined_call_operand.vmem [shape: f32[32,128], index: 0, kind: input, shape index: {}]   ;;  %s1857_s1 = inlined_call_operand.vmem [shape: f32[128,8], index: 1, kind: input, shape index: {}]   ;;  %s1858_s2 = inlined_call_operand.<no memory space> [shape: f32[1], index: 2, kind: input, shape index: {}]   ;;  %s1859_s3 = inlined_call_operand.vmem [shape: f32[32,8], index: 3, kind: output, shape index: {}]  }
   0x1   :  { %8 = sst [smem:[#allocation2]] %s1858_s2 }
   0x2 LB: > { %s938_s15 = sadd.s32 4294967295, %s1485_s14   ;;  %p942_p0 = scmp.ge.s32.totalorder %s1485_s14, 1  ;;  %s1485_s14 = sphi %s1510_s14, %s14_s14  }
   0x3   : > { %p139_p1 = scmp.lt.s32.totalorder %s1485_s14, 3 }
   0x5   : > { %p140_p2 = pnand %p942_p0, %p139_p1 }
   0x6   : > { %v177_v0 = vld [vmem:[%s1857_s1] sm:$0xff] (!%p140_p2)  ;;  %v178_v1 = vld [vmem:[%s1857_s1 + $0x8] sm:$0xff] (!%p140_p2)  ;;  %v1527_v2 = vld [vmem:[%s1857_s1 + $0x10] sm:$0xff] (!%p140_p2)  ;;  %s943_s21 = sshll.u32 (!%p140_p2), %s938_s15, 1  ;;  %s193_s26 = sld [smem:[#allocation2]] (!%p140_p2)  ;;  %vm879_vm0 = vcmask (!%p140_p2), 64512  }
   0x7   : > { %143 = sbr.rel (%p140_p2) target bundleno = 325 (0x145), region = 32  ;;  %v196_v3 = vand.u32 (!%p140_p2), 4294901760, %v177_v0  ;;  %v199_v4 = vand.u32 (!%p140_p2), 4294901760, %v178_v1  ;;  %v1532_v5 = vld [vmem:[%s1857_s1 + $0x18] sm:$0xff] (!%p140_p2)  ;;  %v202_v6 = vand.u32 (!%p140_p2), 4294901760, %v1527_v2  ;;  %v1538_v7 = vld [vmem:[%s1857_s1 + $0x20] sm:$0xff] (!%p140_p2) }
   0x8   : > { %v1543_v8 = vld [vmem:[%s1857_s1 + $0x28] sm:$0xff] (!%p140_p2)  ;;  %v205_v9 = vand.u32 (!%p140_p2), 4294901760, %v1532_v5  ;;  %v208_v11 = vand.u32 (!%p140_p2), 4294901760, %v1538_v7  ;;  %v1557_v14 = vld [vmem:[%s1857_s1 + $0x30] sm:$0xff] (!%p140_p2)  ;;  %v1562_v15 = vld [vmem:[%s1857_s1 + $0x38] sm:$0xff] (!%p140_p2)  ;;  %p164_p3 = scmp.lt.s32.totalorder (!%p140_p2), %s943_s21, 3 }
   0x9   : > { %v1546_v10 = vpack.c.bf16 (!%p140_p2), %v199_v4, %v196_v3  ;;  %v211_v12 = vand.u32 (!%p140_p2), 4294901760, %v1543_v8  ;;  %v214_v17 = vand.u32 (!%p140_p2), 4294901760, %v1557_v14  ;;  %v217_v18 = vand.u32 (!%p140_p2), 4294901760, %v1562_v15  ;;  %v1583_v19 = vld [vmem:[%s1857_s1 + $0x40] sm:$0xff] (!%p140_p2)  ;;  %v1588_v20 = vld [vmem:[%s1857_s1 + $0x48] sm:$0xff] (!%p140_p2)  ;;  %v1611_v25 = vld [vmem:[%s1857_s1 + $0x50] sm:$0xff] (!%p140_p2) }
   0xa   : > { %v1552_v13 = vpack.c.bf16 (!%p140_p2), %v205_v9, %v202_v6  ;;  %v220_v23 = vand.u32 (!%p140_p2), 4294901760, %v1583_v19  ;;  %v223_v24 = vand.u32 (!%p140_p2), 4294901760, %v1588_v20  ;;  %v1618_v27 = vld [vmem:[%s1857_s1 + $0x58] sm:$0xff] (!%p140_p2)  ;;  %v226_v29 = vand.u32 (!%p140_p2), 4294901760, %v1611_v25  ;;  %v1640_v34 = vld [vmem:[%s1857_s1 + $0x60] sm:$0xff] (!%p140_p2)  ;;  %v1645_v35 = vld [vmem:[%s1857_s1 + $0x68] sm:$0xff] (!%p140_p2) }
   0xb   : > { %1268 = vmatprep.subr.bf16.mxu1 (!%p140_p2), %v1546_v10  ;;  %1364 = vmatprep.subr.bf16.mxu0 (!%p140_p2), %v1546_v10  ;;  %v1576_v16 = vpack.c.bf16 (!%p140_p2), %v211_v12, %v208_v11  ;;  %v1604_v22 = vpack.c.bf16 (!%p140_p2), %v217_v18, %v214_v17  ;;  %v1626_v31 = vsub.f32 (!%p140_p2), %v177_v0, %v196_v3  ;;  %v229_v33 = vand.u32 (!%p140_p2), 4294901760, %v1618_v27  ;;  %v1660_v42 = vld [vmem:[%s1857_s1 + $0x70] sm:$0xff] (!%p140_p2)  ;;  %v1677_v46 = vld [vmem:[%s1857_s1 + $0x78] sm:$0xff] (!%p140_p2) }
   0xc   : > { %1270 = vmatpush3.bf16.msra.mxu1 (!%p140_p2), %v1546_v10  ;;  %1366 = vmatpush3.bf16.msra.mxu0 (!%p140_p2), %v1546_v10  ;;  %v1634_v32 = vpack.c.bf16 (!%p140_p2), %v223_v24, %v220_v23  ;;  %v1648_v37 = vsub.f32 (!%p140_p2), %v178_v1, %v199_v4  ;;  %v232_v40 = vand.u32 (!%p140_p2), 4294901760, %v1640_v34  ;;  %v235_v41 = vand.u32 (!%p140_p2), 4294901760, %v1645_v35 }
   0xd   : > { %1272 = vmatprep.subr.bf16.mxu1 (!%p140_p2), %v1552_v13  ;;  %1368 = vmatprep.subr.bf16.mxu0 (!%p140_p2), %v1552_v13  ;;  %v299_v43 = vand.u32 (!%p140_p2), 4294901760, %v1626_v31  ;;  %v1664_v44 = vsub.f32 (!%p140_p2), %v1527_v2, %v202_v6  ;;  %v1672_v45 = vpack.c.bf16 (!%p140_p2), %v229_v33, %v226_v29  ;;  %v1683_v49 = vsub.f32 (!%p140_p2), %v1532_v5, %v205_v9 }
   0xe   : > { %s1861_s21 = smov (!%p164_p3, %s943_s21), 3  ;;  %v306_v48 = vand.u32 4294901760, %v1648_v37  ;;  %v238_v50 = vand.u32 4294901760, %v1660_v42  ;;  %v1695_v52 = vpack.c.bf16 %v235_v41, %v232_v40  ;;  %v241_v53 = vand.u32 4294901760, %v1677_v46 }
   0xf   : > { %s944_s9 = sshll.u32 %s1861_s21, 3  ;;  %v300_v54 = vsub.f32 %v1626_v31, %v299_v43  ;;  %v313_v55 = vand.u32 4294901760, %v1664_v44  ;;  %v320_v57 = vand.u32 4294901760, %v1683_v49  ;;  %v1707_v58 = vsub.f32 %v1538_v7, %v208_v11 }
  0x10   : > { %s167_s12 = scalar_lea.vmem %s1856_s0, %s944_s9  ;;  %1274 = vmatpush3.bf16.msra.mxu1 %v1552_v13  ;;  %1370 = vmatpush3.bf16.msra.mxu0 %v1552_v13  ;;  %v307_v56 = vsub.f32 %v1648_v37, %v306_v48  ;;  %v1712_v59 = vsub.f32 %v1543_v8, %v211_v12  ;;  %v1718_v61 = vsub.f32 %v1557_v14, %v214_v17  ;;  %s173_s29 = scalar_lea.vmem %s1859_s3, %s944_s9 }
  0x11   : > { %v175_v21 = vld [vmem:[%s167_s12] sm:$0xff]  ;;  %1276 = vmatprep.subr.bf16.mxu1 %v1576_v16  ;;  %1372 = vmatprep.subr.bf16.mxu0 %v1576_v16  ;;  %v176_v30 = vld [vmem:[%s167_s12 + $0x8] sm:$0xff]  ;;  %v1723_v62 = vsub.f32 %v1562_v15, %v217_v18  ;;  %v1731_v63 = vpack.c.bf16 %v241_v53, %v238_v50  ;;  %v301_v0 = vand.u32 4294901760, %v300_v54  ;;  %v314_v1 = vsub.f32 %v1664_v44, %v313_v55 }
  0x12   : > { %v1613_v26 = vand.u32 4294901760, %v175_v21  ;;  %v1651_v39 = vand.u32 4294901760, %v176_v30  ;;  %v308_v2 = vand.u32 4294901760, %v307_v56  ;;  %v321_v3 = vsub.f32 %v1683_v49, %v320_v57 }
  0x13   : > { %v327_v4 = vand.u32 4294901760, %v1707_v58  ;;  %v334_v5 = vand.u32 4294901760, %v1712_v59  ;;  %v341_v7 = vand.u32 4294901760, %v1718_v61  ;;  %v348_v8 = vand.u32 4294901760, %v1723_v62 }
  0x14   : > { %v1621_v28 = vsub.f32 %v175_v21, %v1613_v26  ;;  %1278 = vmatpush3.bf16.msra.mxu1 %v1576_v16  ;;  %1374 = vmatpush3.bf16.msra.mxu0 %v1576_v16  ;;  %v1687_v51 = vsub.f32 %v176_v30, %v1651_v39  ;;  %v1395_v9 = vpack.c.bf16 %v306_v48, %v299_v43  ;;  %v315_v11 = vand.u32 4294901760, %v314_v1 }
  0x15   : > { %1280 = vmatprep.subr.bf16.mxu1 %v1604_v22  ;;  %1376 = vmatprep.subr.bf16.mxu0 %v1604_v22  ;;  %v1747_v12 = vsub.f32 %v1583_v19, %v220_v23  ;;  %v1752_v14 = vsub.f32 %v1588_v20, %v223_v24  ;;  %v1299_v15 = vpack.c.bf16 %v308_v2, %v301_v0  ;;  %v322_v17 = vand.u32 4294901760, %v321_v3 }
  0x16   : > { %v278_v36 = vand.u32 4294901760, %v1621_v28  ;;  %v288_v60 = vand.u32 4294901760, %v1687_v51  ;;  %v328_v18 = vsub.f32 %v1707_v58, %v327_v4  ;;  %v335_v21 = vsub.f32 %v1712_v59, %v334_v5 }
  0x17   : > { %v349_v19 = vsub.f32 %v1723_v62, %v348_v8  ;;  %v1399_v20 = vpack.c.bf16 %v320_v57, %v313_v55  ;;  %v355_v23 = vand.u32 4294901760, %v1747_v12  ;;  %v362_v24 = vand.u32 4294901760, %v1752_v14 }
  0x18   : > { %v279_v38 = vsub.f32 %v1621_v28, %v278_v36  ;;  %1194 = vmatprep.mubr.f32.mxu0 %v278_v36  ;;  %1282 = vmatpush3.bf16.msra.mxu1 %v1604_v22  ;;  %v289_v6 = vsub.f32 %v1687_v51, %v288_v60  ;;  %v342_v36 = vsub.f32 %v1718_v61, %v341_v7  ;;  %v336_v48 = vand.u32 4294901760, %v335_v21 }
  0x19   : > { %1378 = vmatpush3.bf16.msra.mxu0 %v1604_v22  ;;  %1284 = vmatprep.subr.bf16.mxu1 %v1634_v32  ;;  %v1303_v43 = vpack.c.bf16 %v322_v17, %v315_v11  ;;  %v1772_v54 = vsub.f32 %v1618_v27, %v229_v33  ;;  %v350_v56 = vand.u32 4294901760, %v349_v19  ;;  %v1777_v57 = vsub.f32 %v1640_v34, %v232_v40 }
  0x1a   : > { %1380 = vmatprep.subr.bf16.mxu0 %v1634_v32  ;;  %v280_v47 = vand.u32 4294901760, %v279_v38  ;;  %v290_v30 = vand.u32 4294901760, %v289_v6  ;;  %v1767_v38 = vsub.f32 %v1611_v25, %v226_v29  ;;  %v343_v55 = vand.u32 4294901760, %v342_v36 }
  0x1b   : > { %v356_v25 = vsub.f32 %v1747_v12, %v355_v23  ;;  %v363_v29 = vsub.f32 %v1752_v14, %v362_v24  ;;  %v1785_v27 = vsub.f32 %v1645_v35, %v235_v41  ;;  %v376_v34 = vand.u32 4294901760, %v1772_v54 }
  0x1c   : > { %1089 = vmatprep.mubr.f32.mxu1 %v280_v47  ;;  %1286 = vmatpush3.bf16.msra.mxu1 %v1634_v32  ;;  %v329_v47 = vand.u32 4294901760, %v328_v18  ;;  %v369_v0 = vand.u32 4294901760, %v1767_v38  ;;  %v1311_v40 = vpack.c.bf16 %v350_v56, %v343_v55  ;;  %v1407_v1 = vpack.c.bf16 %v348_v8, %v341_v7 }
  0x1d   : > { %1382 = vmatpush3.bf16.msra.mxu0 %v1634_v32  ;;  %1288 = vmatprep.subr.bf16.mxu1 %v1672_v45  ;;  %v383_v2 = vand.u32 4294901760, %v1777_v57  ;;  %v357_v3 = vand.u32 4294901760, %v356_v25  ;;  %v364_v6 = vand.u32 4294901760, %v363_v29  ;;  %v390_v41 = vand.u32 4294901760, %v1785_v27 }
  0x1e   : > { %1384 = vmatprep.subr.bf16.mxu0 %v1672_v45  ;;  %v1307_v33 = vpack.c.bf16 %v336_v48, %v329_v47  ;;  %v370_v35 = vsub.f32 %v1767_v38, %v369_v0  ;;  %v1802_v7 = vsub.f32 %v1677_v46, %v241_v53  ;;  %v1411_v8 = vpack.c.bf16 %v362_v24, %v355_v23 }
  0x1f   : > { %v384_v11 = vsub.f32 %v1777_v57, %v383_v2  ;;  %v1415_v46 = vpack.c.bf16 %v376_v34, %v369_v0  ;;  %v1419_v23 = vpack.c.bf16 %v390_v41, %v383_v2  ;;  %v1331_v55 = vpack.c.bf16 %v1648_v37, %v1626_v31 }
  0x20   : > { %1290 = vmatpush3.bf16.msra.mxu1 %v1672_v45  ;;  %v371_v17 = vand.u32 4294901760, %v370_v35  ;;  %v1335_v56 = vpack.c.bf16 %v1683_v49, %v1664_v44  ;;  %v1339_v31 = vpack.c.bf16 %v1712_v59, %v1707_v58  ;;  %v1343_v37 = vpack.c.bf16 %v1723_v62, %v1718_v61 }
  0x21   : > { %1386 = vmatpush3.bf16.msra.mxu0 %v1672_v45  ;;  %1292 = vmatprep.subr.bf16.mxu1 %v1695_v52  ;;  %v385_v53 = vand.u32 4294901760, %v384_v11 }
  0x22   : > { %1388 = vmatprep.subr.bf16.mxu0 %v1695_v52 }
  0x24   : > { %1294 = vmatpush3.bf16.msra.mxu1 %v1695_v52 }
  0x25   : > { %1390 = vmatpush3.bf16.msra.mxu0 %v1695_v52  ;;  %1296 = vmatprep.subr.bf16.mxu1 %v1731_v63 }
  0x26   : > { %1392 = vmatprep.subr.bf16.mxu0 %v1731_v63 }
  0x28   : > { %1298 = vmatpush3.bf16.msra.mxu1 %v1731_v63 }
  0x29   : > { %1394 = vmatpush3.bf16.msra.mxu0 %v1731_v63  ;;  %1300 = vmatprep.subr.bf16.mxu1 %v1299_v15 }
  0x2a   : > { %1396 = vmatprep.subr.bf16.mxu0 %v1395_v9 }
  0x2b   : > { %1090 = vmatmul.mubr.f32.vlgmr.msra.gmra.mrb[0].mxu1 %v290_v30 }
  0x2c   : > { %1195 = vmatmul.mubr.f32.vlgmr.msra.gmra.mrb[0].mxu0 %v288_v60  ;;  %1302 = vmatpush3.bf16.msra.mxu1 %v1299_v15  ;;  %v1403_v60 = vpack.c.bf16 %v334_v5, %v327_v4  ;;  %v377_v4 = vsub.f32 %v1772_v54, %v376_v34  ;;  %v1797_v5 = vsub.f32 %v1660_v42, %v238_v50  ;;  %v404_v50 = vand.u32 4294901760, %v1802_v7 }
  0x2d   : > { %1398 = vmatpush3.bf16.msra.mxu0 %v1395_v9  ;;  %1304 = vmatprep.subr.bf16.mxu1 %v1303_v43  ;;  %v1315_v9 = vpack.c.bf16 %v364_v6, %v357_v3  ;;  %v391_v15 = vsub.f32 %v1785_v27, %v390_v41 }
  0x2e   : > { %1400 = vmatprep.subr.bf16.mxu0 %v1399_v20  ;;  %1124 = vmatprep.mubr.f32.mxu1 %v1613_v26  ;;  %v378_v18 = vand.u32 4294901760, %v377_v4  ;;  %v397_v42 = vand.u32 4294901760, %v1797_v5  ;;  %v405_v19 = vsub.f32 %v1802_v7, %v404_v50 }
  0x2f   : > { %1229 = vmatprep.mubr.f32.mxu0 %v1613_v26  ;;  %v392_v30 = vand.u32 4294901760, %v391_v15 }
  0x30   : > { %1306 = vmatpush3.bf16.msra.mxu1 %v1303_v43  ;;  %v1319_v21 = vpack.c.bf16 %v378_v18, %v371_v17  ;;  %v398_v36 = vsub.f32 %v1797_v5, %v397_v42  ;;  %v406_v43 = vand.u32 4294901760, %v405_v19  ;;  %v1423_v48 = vpack.c.bf16 %v404_v50, %v397_v42 }
  0x31   : > { %1402 = vmatpush3.bf16.msra.mxu0 %v1399_v20  ;;  %1308 = vmatprep.subr.bf16.mxu1 %v1307_v33  ;;  %v1323_v20 = vpack.c.bf16 %v392_v30, %v385_v53 }
  0x32   : > { %1404 = vmatprep.subr.bf16.mxu0 %v1403_v60  ;;  %v399_v24 = vand.u32 4294901760, %v398_v36 }
  0x34   : > { %1310 = vmatpush3.bf16.msra.mxu1 %v1307_v33  ;;  %v1327_v47 = vpack.c.bf16 %v406_v43, %v399_v24 }
  0x35   : > { %1406 = vmatpush3.bf16.msra.mxu0 %v1403_v60  ;;  %1312 = vmatprep.subr.bf16.mxu1 %v1311_v40 }
  0x36   : > { %1408 = vmatprep.subr.bf16.mxu0 %v1407_v1 }
  0x38   : > { %1314 = vmatpush3.bf16.msra.mxu1 %v1311_v40 }
  0x39   : > { %1410 = vmatpush3.bf16.msra.mxu0 %v1407_v1  ;;  %1316 = vmatprep.subr.bf16.mxu1 %v1315_v9 }
  0x3a   : > { %1412 = vmatprep.subr.bf16.mxu0 %v1411_v8 }
  0x3c   : > { %1318 = vmatpush3.bf16.msra.mxu1 %v1315_v9 }
  0x3d   : > { %1414 = vmatpush3.bf16.msra.mxu0 %v1411_v8  ;;  %1320 = vmatprep.subr.bf16.mxu1 %v1319_v21 }
  0x3e   : > { %1416 = vmatprep.subr.bf16.mxu0 %v1415_v46 }
  0x40   : > { %1322 = vmatpush3.bf16.msra.mxu1 %v1319_v21 }
  0x41   : > { %1418 = vmatpush3.bf16.msra.mxu0 %v1415_v46  ;;  %1324 = vmatprep.subr.bf16.mxu1 %v1323_v20 }
  0x42   : > { %1420 = vmatprep.subr.bf16.mxu0 %v1419_v23 }
  0x44   : > { %1326 = vmatpush3.bf16.msra.mxu1 %v1323_v20 }
  0x45   : > { %1422 = vmatpush3.bf16.msra.mxu0 %v1419_v23  ;;  %1328 = vmatprep.subr.bf16.mxu1 %v1327_v47 }
  0x46   : > { %1424 = vmatprep.subr.bf16.mxu0 %v1423_v48 }
  0x48   : > { %1330 = vmatpush3.bf16.msra.mxu1 %v1327_v47 }
  0x49   : > { %1426 = vmatpush3.bf16.msra.mxu0 %v1423_v48  ;;  %1332 = vmatprep.subr.bf16.mxu1 %v1331_v55 }
  0x4a   : > { %1428 = vmatprep.subr.bf16.mxu0 %v1546_v10 }
  0x4b   : > { %1125 = vmatmul.mubr.f32.vlgmr.msra.gmra.mrb[0].mxu1 %v1651_v39 }
  0x4c   : > { %1230 = vmatmul.mubr.f32.vlgmr.msra.gmra.mrb[0].mxu0 %v1651_v39  ;;  %1334 = vmatpush3.bf16.msra.mxu1 %v1331_v55 }
  0x4d   : > { %1430 = vmatpush3.bf16.msra.mxu0 %v1546_v10  ;;  %1336 = vmatprep.subr.bf16.mxu1 %v1335_v56  ;;  %v1347_v10 = vpack.c.bf16 %v1752_v14, %v1747_v12 }
  0x4e   : > { %1432 = vmatprep.subr.bf16.mxu0 %v1552_v13  ;;  %1159 = vmatprep.mubr.f32.mxu1 %v1621_v28 }
  0x4f   : > { %1264 = vmatprep.mubr.f32.mxu0 %v1613_v26  ;;  %v194_v26 = vstv %s193_s26 }
  0x50   : > { %1338 = vmatpush3.bf16.msra.mxu1 %v1335_v56 }
  0x51   : > { %1434 = vmatpush3.bf16.msra.mxu0 %v1552_v13  ;;  %1340 = vmatprep.subr.bf16.mxu1 %v1339_v31  ;;  %v1351_v13 = vpack.c.bf16 %v1772_v54, %v1767_v38 }
  0x52   : > { %1436 = vmatprep.subr.bf16.mxu0 %v1576_v16 }
  0x54   : > { %1342 = vmatpush3.bf16.msra.mxu1 %v1339_v31 }
  0x55   : > { %1438 = vmatpush3.bf16.msra.mxu0 %v1576_v16  ;;  %1344 = vmatprep.subr.bf16.mxu1 %v1343_v37  ;;  %v1355_v16 = vpack.c.bf16 %v1785_v27, %v1777_v57 }
  0x56   : > { %1440 = vmatprep.subr.bf16.mxu0 %v1604_v22 }
  0x58   : > { %1346 = vmatpush3.bf16.msra.mxu1 %v1343_v37 }
  0x59   : > { %1442 = vmatpush3.bf16.msra.mxu0 %v1604_v22  ;;  %1348 = vmatprep.subr.bf16.mxu1 %v1347_v10  ;;  %v1359_v22 = vpack.c.bf16 %v1802_v7, %v1797_v5 }
  0x5a   : > { %1444 = vmatprep.subr.bf16.mxu0 %v1634_v32 }
  0x5c   : > { %1350 = vmatpush3.bf16.msra.mxu1 %v1347_v10 }
  0x5d   : > { %1446 = vmatpush3.bf16.msra.mxu0 %v1634_v32  ;;  %1352 = vmatprep.subr.bf16.mxu1 %v1351_v13 }
  0x5e   : > { %1448 = vmatprep.subr.bf16.mxu0 %v1672_v45 }
  0x60   : > { %1354 = vmatpush3.bf16.msra.mxu1 %v1351_v13 }
  0x61   : > { %1450 = vmatpush3.bf16.msra.mxu0 %v1672_v45  ;;  %1356 = vmatprep.subr.bf16.mxu1 %v1355_v16 }
  0x62   : > { %1452 = vmatprep.subr.bf16.mxu0 %v1695_v52 }
  0x64   : > { %1358 = vmatpush3.bf16.msra.mxu1 %v1355_v16 }
  0x65   : > { %1454 = vmatpush3.bf16.msra.mxu0 %v1695_v52  ;;  %1360 = vmatprep.subr.bf16.mxu1 %v1359_v22 }
  0x66   : > { %1456 = vmatprep.subr.bf16.mxu0 %v1731_v63 }
  0x68   : > { %1362 = vmatpush3.bf16.msra.mxu1 %v1359_v22 }
  0x69   : > { %1458 = vmatpush3.bf16.msra.mxu0 %v1731_v63 }
  0x6b   : > { %1160 = vmatmul.mubr.f32.vlgmr.msra.gmra.mrb[0].mxu1 %v1687_v51 }
  0x6c   : > { %1265 = vmatmul.mubr.f32.vlgmr.msra.gmra.mrb[0].mxu0 %v1651_v39 }
 0x13e   : > { %v1161_v28 = vpop.f32.mrb[0].mxu1 }
 0x13f   : > { %v1266_v32 = vpop.f32.mrb[0].mxu0  ;;  %v1459_v44 = vadd.f32 %v1161_v28, %v194_v26  ;;  %v553_v45 = vpop.f32.mrb[1].mxu1 }
 0x140   : > { %v869_v49 = vpop.f32.mrb[1].mxu0  ;;  %v1461_v58 = vadd.f32 %v553_v45, %v194_v26 }
 0x141   : > { %v1460_v52 = vadd.f32 %v1459_v44, %v1266_v32 }
 0x142   : > { %v1462_v59 = vadd.f32 %v1461_v58, %v869_v49 }
 0x143   : > { %881 = vst.msk [vmem:[%s173_s29 + $0x8] sm:$0xff] %vm879_vm0, %v1460_v52 }
 0x144   : > { %880 = vst.msk [vmem:[%s173_s29] sm:$0xff] %vm879_vm0, %v1462_v59 }
 0x145 PF: > { %s14_s14 = sadd.s32 1, %s1485_s14  }
 0x146   : > { %p11_p4 = scmp.ge.s32.totalorder %s14_s14, 4  }
 0x148   :  { %13 = sbr.rel (!%p11_p4) target bundleno = 2 (0x2), region = 62 }

</bundles_post_ra>
